<compile_context>
chip_gen: v7x
topology: tpu7x:2x2x1
jax: 0.10.0
libtpu: 0.0.40
codegen_flags: <defaults>
</compile_context>

<pallas_src>
import functools

import jax
import jax.numpy as jnp
from jax.experimental import pallas as pl
from jax.experimental.pallas import tpu as pltpu


_MAX_HW_TILE = 2048             # lane-dense tile width (multiple of 128)
_LARGE_VMEM = 96 * 1024 * 1024  # threshold identifying 128-MiB-VMEM chips


def _vmem_budgets():
    """(vmem_limit_bytes, target_tile_bytes), chosen per chip generation."""
    try:
        cap = int(pltpu.get_tpu_info().vmem_capacity_bytes)
    except Exception:           # unknown chip / interpret mode -> conservative
        cap = 64 * 1024 * 1024
    if cap >= _LARGE_VMEM:      # v5e / v6e: 128 MiB physical VMEM
        return 64 * 1024 * 1024, 8 * 1024 * 1024
    return 32 * 1024 * 1024, 4 * 1024 * 1024  # v7x (64 MiB physical) / default


def _sublane(dtype):
    """Sublane packing granularity: 8 (f32), 16 (bf16/f16), 32 (int8/fp8)."""
    return max(8, 8 * (4 // jnp.dtype(dtype).itemsize))


def _choose_tiles(nc, hw, elem_bytes, sublane, target_bytes):
    """Pick (row_tile, hw_tile) for the (N*C, H*W) view (two-phase path)."""
    hw_t = hw if hw <= _MAX_HW_TILE else _MAX_HW_TILE    # full dim or 128-mult

    rows_target = max(sublane, target_bytes // max(1, hw_t * elem_bytes))
    rows_target = (int(rows_target) // sublane) * sublane

    if nc <= sublane:
        row_t = nc                                        # full dim (legal)
    else:
        row_t = max(sublane, min(rows_target, (nc // sublane) * sublane))
        # Keep >= 2 row blocks so the "parallel" rows axis of the pooling pass
        # can be sharded across v7x's two TensorCores.
        if nc >= 2 * sublane:
            half = (nc // 2 // sublane) * sublane
            row_t = min(row_t, max(sublane, half))
    return row_t, hw_t


# ---------------------------------------------------------------------------
# Fused single-pass kernel: pool + gate + rescale, one sample per grid step.
# ---------------------------------------------------------------------------
def _make_fused_kernel(inv_hw, out_dtype):
    def fused_kernel(x_ref, wdt_ref, bd_ref, wu_ref, bu_ref, o_ref):
        xf = x_ref[...].astype(jnp.float32)                      # (C, HW)
        pooled = jnp.sum(xf, axis=-1, keepdims=True) * inv_hw    # (C, 1)
        # down + ReLU:   z[0, i] = relu(sum_c pooled[c] * Wd[i, c] + bd[i])
        z = jnp.maximum(
            jnp.sum(wdt_ref[...] * pooled, axis=0, keepdims=True) + bd_ref[...],
            0.0)                                                 # (1, I)
        # up + sigmoid:  s[c, 0] = sigmoid(sum_i Wu[c, i] * z[i] + bu[c])
        s = jax.nn.sigmoid(
            jnp.sum(wu_ref[...] * z, axis=-1, keepdims=True) + bu_ref[...])  # (C,1)
        o_ref[...] = (xf * s).astype(out_dtype)
    return fused_kernel


# ---------------------------------------------------------------------------
# Two-phase streaming kernels.
# ---------------------------------------------------------------------------
def _make_pool_kernel(hw, hw_t, row_t, inv_hw):
    """Tiled mean over the last (HW) axis of an (NC, HW) view."""
    ragged_hw = (hw % hw_t) != 0

    def pool_kernel(x_ref, o_ref):
        h = pl.program_id(1)
        last = pl.num_programs(1) - 1

        @pl.when(h == 0)
        def _():
            o_ref[...] = jnp.zeros_like(o_ref)

        if ragged_hw:
            # Full blocks accumulate unmasked; only the tail block pays for
            # the iota/compare/select mask (zero-safe for the sum).
            @pl.when(h < last)
            def _():
                o_ref[...] += jnp.sum(x_ref[...].astype(jnp.float32),
                                      axis=-1, keepdims=True)

            @pl.when(h == last)
            def _():
                x = x_ref[...].astype(jnp.float32)
                col = (jax.lax.broadcasted_iota(jnp.int32, (row_t, hw_t), 1)
                       + h * hw_t)
                x = jnp.where(col < hw, x, 0.0)
                o_ref[...] += jnp.sum(x, axis=-1, keepdims=True)
        else:
            o_ref[...] += jnp.sum(x_ref[...].astype(jnp.float32),
                                  axis=-1, keepdims=True)

        @pl.when(h == last)
        def _():
            o_ref[...] = o_ref[...] * inv_hw      # mean = sum * precomputed 1/HW

    return pool_kernel


def _make_rescale_kernel(mul_dtype):
    def rescale_kernel(x_ref, g_ref, o_ref):
        # x_ref: (row_t, hw_t) slab, g_ref: (row_t, 1) per-row gate
        o_ref[...] = (x_ref[...].astype(mul_dtype) * g_ref[...]).astype(o_ref.dtype)
    return rescale_kernel


# ---------------------------------------------------------------------------
# Wrapper.
# ---------------------------------------------------------------------------
@functools.partial(jax.jit, static_argnames=("force_two_phase",))
def se_block(x, w_down, b_down, w_up, b_up, *, force_two_phase=False):
    """x: (N, C, H, W). w_down (I, C), b_down (I, 1), w_up (C, I), b_up (C, 1)."""
    N, C, H, W = x.shape
    I = w_down.shape[0]
    HW = H * W
    NC = N * C
    elem_bytes = jnp.dtype(x.dtype).itemsize
    inv_hw = 1.0 / HW

    vmem_limit, target_tile_bytes = _vmem_budgets()

    slab_bytes = C * HW * elem_bytes            # one sample's slab in VMEM
    total_bytes = NC * HW * elem_bytes
    fused_ok = (
        not force_two_phase
        # in + out, double-buffered, plus headroom for weights/temps
        and slab_bytes * 4 + (1 << 20) <= vmem_limit
        # either the whole problem is tiny (launch-bound) or slabs are big
        # enough that the per-step pipeline overhead is amortized
        and (total_bytes <= 32 * 1024 * 1024 or slab_bytes >= 512 * 1024)
    )

    if fused_ok:
        # ---- fused single pass: 1 HBM read + 1 HBM write of x, 1 launch ----
        x3 = x.reshape(N, C, HW)
        wdt = w_down.astype(jnp.float32).T               # (C, I)
        bdr = b_down.astype(jnp.float32).reshape(1, I)   # (1, I)
        wu = w_up.astype(jnp.float32)                    # (C, I)
        buc = b_up.astype(jnp.float32).reshape(C, 1)     # (C, 1)

        out3 = pl.pallas_call(
            _make_fused_kernel(inv_hw, x.dtype),
            out_shape=jax.ShapeDtypeStruct((N, C, HW), x.dtype),
            grid_spec=pltpu.PrefetchScalarGridSpec(
                num_scalar_prefetch=0,
                grid=(N,),
                in_specs=[
                    pl.BlockSpec((None, C, HW), lambda n: (n, 0, 0)),
                    pl.BlockSpec((C, I), lambda n: (0, 0)),
                    pl.BlockSpec((1, I), lambda n: (0, 0)),
                    pl.BlockSpec((C, I), lambda n: (0, 0)),
                    pl.BlockSpec((C, 1), lambda n: (0, 0)),
                ],
                out_specs=pl.BlockSpec((None, C, HW), lambda n: (n, 0, 0)),
            ),
            compiler_params=pltpu.CompilerParams(
                dimension_semantics=("parallel",),
                vmem_limit_bytes=vmem_limit),
        )(x3, wdt, bdr, wu, buc)
        return out3.reshape(N, C, H, W)

    # ---- two-phase streaming fallback ---------------------------------------
    x2 = x.reshape(NC, HW)
    sublane = _sublane(x.dtype)
    row_t, hw_t = _choose_tiles(NC, HW, elem_bytes, sublane, target_tile_bytes)
    grid_rows = pl.cdiv(NC, row_t)
    grid_hw = pl.cdiv(HW, hw_t)

    # phase 1: pooled mean over HW (tiled reduction, f32 accum, HW axis last)
    pooled = pl.pallas_call(
        _make_pool_kernel(HW, hw_t, row_t, inv_hw),
        out_shape=jax.ShapeDtypeStruct((NC, 1), jnp.float32),
        grid_spec=pltpu.PrefetchScalarGridSpec(
            num_scalar_prefetch=0,
            grid=(grid_rows, grid_hw),
            in_specs=[pl.BlockSpec((row_t, hw_t), lambda r, h: (r, h))],
            out_specs=pl.BlockSpec((row_t, 1), lambda r, h: (r, 0)),
        ),
        compiler_params=pltpu.CompilerParams(
            dimension_semantics=("parallel", "arbitrary"),
            vmem_limit_bytes=vmem_limit),
    )(x2)

    # excitation gate: tiny batched matmuls, lane-dense, off the streaming loop
    pooled_nc = pooled.reshape(N, C)
    z = jnp.maximum(
        pooled_nc @ w_down.astype(jnp.float32).T
        + b_down.astype(jnp.float32).reshape(1, -1), 0.0)
    s = jax.nn.sigmoid(
        z @ w_up.astype(jnp.float32).T
        + b_up.astype(jnp.float32).reshape(1, -1))

    mul_dtype = jnp.float32 if x.dtype == jnp.float32 else x.dtype
    gate = s.astype(mul_dtype).reshape(NC, 1)

    # phase 2: tiled, lane-dense elementwise rescale
    out2 = pl.pallas_call(
        _make_rescale_kernel(mul_dtype),
        out_shape=jax.ShapeDtypeStruct((NC, HW), x.dtype),
        grid_spec=pltpu.PrefetchScalarGridSpec(
            num_scalar_prefetch=0,
            grid=(grid_rows, grid_hw),
            in_specs=[pl.BlockSpec((row_t, hw_t), lambda r, h: (r, h)),
                      pl.BlockSpec((row_t, 1), lambda r, h: (r, 0))],
            out_specs=pl.BlockSpec((row_t, hw_t), lambda r, h: (r, h)),
        ),
        compiler_params=pltpu.CompilerParams(
            dimension_semantics=("parallel", "parallel"),
            vmem_limit_bytes=vmem_limit),
    )(x2, gate)

    return out2.reshape(N, C, H, W)


def se_block_ref(x, w_down, b_down, w_up, b_up):
    """Pure-JAX reference mirroring the PyTorch forward."""
    pooled = jnp.mean(x, axis=(2, 3))                       # (N, C)
    z = jax.nn.relu(pooled @ w_down.T + b_down[:, 0])       # (N, I)
    s = jax.nn.sigmoid(z @ w_up.T + b_up[:, 0])             # (N, C)
    return x * s[:, :, None, None]


def _run_case(key, N, C, H, W, internal, force_two_phase=False):
    kx, kwd, kbd, kwu, kbu = jax.random.split(key, 5)
    x = jax.random.normal(kx, (N, C, H, W), dtype=jnp.float32)
    w_down = jax.random.normal(kwd, (internal, C), dtype=jnp.float32) * 0.5
    b_down = jax.random.normal(kbd, (internal, 1), dtype=jnp.float32) * 0.1
    w_up = jax.random.normal(kwu, (C, internal), dtype=jnp.float32) * 0.5
    b_up = jax.random.normal(kbu, (C, 1), dtype=jnp.float32) * 0.1

    out = jax.block_until_ready(
        se_block(x, w_down, b_down, w_up, b_up, force_two_phase=force_two_phase))
    ref = se_block_ref(x, w_down, b_down, w_up, b_up)
    assert out.shape == (N, C, H, W)
    assert jnp.allclose(out, ref, atol=1e-5, rtol=1e-5), "mismatch vs reference"


if __name__ == "__main__":
    key = jax.random.PRNGKey(0)
    k1, k2, k3 = jax.random.split(key, 3)

    # Primary config (SEBlock(input_channels=4, internal_neurons=2)) -> fused path
    _run_case(k1, N=2, C=4, H=16, W=16, internal=2)

    # Two-phase streaming path with a ragged HW tail (HW = 2304 > 2048)
    _run_case(k2, N=1, C=8, H=48, W=48, internal=4, force_two_phase=True)

    # Two-phase path exercising the row-block split (NC = 32 -> grid_rows >= 2)
    _run_case(k3, N=4, C=8, H=48, W=48, internal=4, force_two_phase=True)

    print("KERNEL_OK")
</pallas_src>

<mosaic_0001>
module attributes {stable_mosaic.version = 11 : i64} {
  func.func @fused_kernel(%arg0: i32, %arg1: memref<1x4x256xf32, #tpu.memory_space<vmem>>, %arg2: memref<4x2xf32, #tpu.memory_space<vmem>>, %arg3: memref<1x2xf32, #tpu.memory_space<vmem>>, %arg4: memref<4x2xf32, #tpu.memory_space<vmem>>, %arg5: memref<4x1xf32, #tpu.memory_space<vmem>>, %arg6: memref<1x4x256xf32, #tpu.memory_space<vmem>>) attributes {dimension_semantics = [#tpu.dimension_semantics<parallel>], iteration_bounds = array<i64: 2>, scalar_prefetch = 0 : i64, scratch_operands = 0 : i64, tpu.core_type = #tpu.core_type<tc>, window_params = [{transform_indices = @transform_0, window_bounds = array<i64: 1, 4, 256>}, {pipeline_mode = #tpu.pipeline_mode<synchronous>, transform_indices = @transform_1, window_bounds = array<i64: 4, 2>}, {pipeline_mode = #tpu.pipeline_mode<synchronous>, transform_indices = @transform_2, window_bounds = array<i64: 1, 2>}, {pipeline_mode = #tpu.pipeline_mode<synchronous>, transform_indices = @transform_3, window_bounds = array<i64: 4, 2>}, {pipeline_mode = #tpu.pipeline_mode<synchronous>, transform_indices = @transform_4, window_bounds = array<i64: 4, 1>}, {transform_indices = @transform_5, window_bounds = array<i64: 1, 4, 256>}]} {
    %c0 = arith.constant 0 : index
    %c0_0 = arith.constant 0 : index
    %c0_1 = arith.constant 0 : index
    %0 = vector.load %arg1[%c0, %c0_0, %c0_1] : memref<1x4x256xf32, #tpu.memory_space<vmem>>, vector<1x4x256xf32>
    %1 = vector.shape_cast %0 : vector<1x4x256xf32> to vector<4x256xf32>
    %cst = arith.constant dense<0.000000e+00> : vector<4xf32>
    %2 = vector.multi_reduction <add>, %1, %cst [1] : vector<4x256xf32> to vector<4xf32>
    %3 = vector.shape_cast %2 : vector<4xf32> to vector<4x1xf32>
    %cst_2 = arith.constant 3.906250e-03 : f32
    %4 = vector.broadcast %cst_2 : f32 to vector<4x1xf32>
    %5 = arith.mulf %3, %4 : vector<4x1xf32>
    %c0_3 = arith.constant 0 : index
    %c0_4 = arith.constant 0 : index
    %6 = vector.load %arg2[%c0_3, %c0_4] : memref<4x2xf32, #tpu.memory_space<vmem>>, vector<4x2xf32>
    %7 = vector.broadcast %5 : vector<4x1xf32> to vector<4x2xf32>
    %8 = arith.mulf %6, %7 : vector<4x2xf32>
    %cst_5 = arith.constant dense<0.000000e+00> : vector<2xf32>
    %9 = vector.multi_reduction <add>, %8, %cst_5 [0] : vector<4x2xf32> to vector<2xf32>
    %10 = vector.shape_cast %9 : vector<2xf32> to vector<1x2xf32>
    %c0_6 = arith.constant 0 : index
    %c0_7 = arith.constant 0 : index
    %11 = vector.load %arg3[%c0_6, %c0_7] : memref<1x2xf32, #tpu.memory_space<vmem>>, vector<1x2xf32>
    %12 = arith.addf %10, %11 : vector<1x2xf32>
    %cst_8 = arith.constant 0.000000e+00 : f32
    %13 = vector.broadcast %cst_8 : f32 to vector<1x2xf32>
    %14 = arith.maximumf %12, %13 : vector<1x2xf32>
    %c0_9 = arith.constant 0 : index
    %c0_10 = arith.constant 0 : index
    %15 = vector.load %arg4[%c0_9, %c0_10] : memref<4x2xf32, #tpu.memory_space<vmem>>, vector<4x2xf32>
    %16 = vector.broadcast %14 : vector<1x2xf32> to vector<4x2xf32>
    %17 = arith.mulf %15, %16 : vector<4x2xf32>
    %cst_11 = arith.constant dense<0.000000e+00> : vector<4xf32>
    %18 = vector.multi_reduction <add>, %17, %cst_11 [1] : vector<4x2xf32> to vector<4xf32>
    %19 = vector.shape_cast %18 : vector<4xf32> to vector<4x1xf32>
    %c0_12 = arith.constant 0 : index
    %c0_13 = arith.constant 0 : index
    %20 = vector.load %arg5[%c0_12, %c0_13] : memref<4x1xf32, #tpu.memory_space<vmem>>, vector<4x1xf32>
    %21 = arith.addf %19, %20 : vector<4x1xf32>
    %22 = arith.negf %21 : vector<4x1xf32>
    %23 = math.exp %22 : vector<4x1xf32>
    %cst_14 = arith.constant 1.000000e+00 : f32
    %24 = vector.broadcast %cst_14 : f32 to vector<4x1xf32>
    %25 = arith.addf %24, %23 : vector<4x1xf32>
    %26 = arith.divf %24, %25 : vector<4x1xf32>
    %27 = vector.broadcast %26 : vector<4x1xf32> to vector<4x256xf32>
    %28 = arith.mulf %1, %27 : vector<4x256xf32>
    %c0_15 = arith.constant 0 : index
    %c0_16 = arith.constant 0 : index
    %c0_17 = arith.constant 0 : index
    %29 = vector.load %arg6[%c0_15, %c0_16, %c0_17] : memref<1x4x256xf32, #tpu.memory_space<vmem>>, vector<1x4x256xf32>
    %30 = vector.shape_cast %29 : vector<1x4x256xf32> to vector<4x256xf32>
    %31 = vector.shape_cast %28 : vector<4x256xf32> to vector<1x4x256xf32>
    tpu.vector_store %arg6[%c0_15, %c0_16, %c0_17], %31 {strides = array<i32>} : memref<1x4x256xf32, #tpu.memory_space<vmem>>, vector<1x4x256xf32>,
    return
  }
  func.func @transform_0(%arg0: i32) -> (i32, i32, i32) {
    %c0_i32 = arith.constant 0 : i32
    %c0_i32_0 = arith.constant 0 : i32
    %c0_i32_1 = arith.constant 0 : i32
    return %arg0, %c0_i32, %c0_i32_0 : i32, i32, i32
  }
  func.func @transform_1(%arg0: i32) -> (i32, i32) {
    %c0_i32 = arith.constant 0 : i32
    %c0_i32_0 = arith.constant 0 : i32
    %c0_i32_1 = arith.constant 0 : i32
    return %c0_i32, %c0_i32_0 : i32, i32
  }
  func.func @transform_2(%arg0: i32) -> (i32, i32) {
    %c0_i32 = arith.constant 0 : i32
    %c0_i32_0 = arith.constant 0 : i32
    %c0_i32_1 = arith.constant 0 : i32
    return %c0_i32, %c0_i32_0 : i32, i32
  }
  func.func @transform_3(%arg0: i32) -> (i32, i32) {
    %c0_i32 = arith.constant 0 : i32
    %c0_i32_0 = arith.constant 0 : i32
    %c0_i32_1 = arith.constant 0 : i32
    return %c0_i32, %c0_i32_0 : i32, i32
  }
  func.func @transform_4(%arg0: i32) -> (i32, i32) {
    %c0_i32 = arith.constant 0 : i32
    %c0_i32_0 = arith.constant 0 : i32
    %c0_i32_1 = arith.constant 0 : i32
    return %c0_i32, %c0_i32_0 : i32, i32
  }
  func.func @transform_5(%arg0: i32) -> (i32, i32, i32) {
    %c0_i32 = arith.constant 0 : i32
    %c0_i32_0 = arith.constant 0 : i32
    %c0_i32_1 = arith.constant 0 : i32
    return %arg0, %c0_i32, %c0_i32_0 : i32, i32, i32
  }
}

</mosaic_0001>

<bundles_post_ra>
// kernel: se_block.1
= control target key start
LH: loop header
LB: loop body
LE: loop exit
PB: predicated region body
PF: predicated region fallthrough
CT: control target
= control target key end

     0   :  { %s406_s18 = smov 0   ;;  %s444_s0 = inlined_call_operand.vmem [shape: f32[2,4,256], index: 0, kind: input, shape index: {}]   ;;  %s445_s1 = inlined_call_operand.vmem [shape: f32[4,2], index: 1, kind: input, shape index: {}]   ;;  %s446_s2 = inlined_call_operand.vmem [shape: f32[1,2], index: 2, kind: input, shape index: {}]   ;;  %s447_s3 = inlined_call_operand.vmem [shape: f32[4,2], index: 3, kind: input, shape index: {}]   ;;  %s448_s4 = inlined_call_operand.vmem [shape: f32[4,1], index: 4, kind: input, shape index: {}]   ;;  %s449_s5 = inlined_call_operand.vmem [shape: f32[2,4,256], index: 5, kind: output, shape index: {}]  }
   0x1 LB: > { %s335_s19 = sadd.s32 4294967295, %s372_s18   ;;  %p339_p0 = scmp.ge.s32.totalorder %s372_s18, 1  ;;  %s372_s18 = sphi %s406_s18, %s15_s18  }
   0x2   : > { %p187_p1 = scmp.lt.s32.totalorder %s372_s18, 3 }
   0x4   : > { %p188_p2 = pnand %p339_p0, %p187_p1 }
   0x5   : > { %p215_p3 = scmp.lt.s32.totalorder (!%p188_p2), %s335_s19, 1  ;;  %vm229_vm0 = vcmask (!%p188_p2), 1043456   ;;  %v236_v5 = vld [vmem:[%s445_s1] sm:$0xf] (!%p188_p2)  ;;  %vm238_vm1 = vcmask (!%p188_p2), 11264   ;;  %v250_v13 = vlaneseq (!%p188_p2)  ;;  %v374_v26 = vmov (!%p188_p2), 0  }
   0x6   : > { %191 = sbr.rel (%p188_p2) target bundleno = 493 (0x1ed), region = 40  ;;  %v246_v17 = vld [vmem:[%s446_s2] sm:$0x1] (!%p188_p2)  ;;  %359 = vset.pattern.permute.xlu1 (!%p188_p2), %v374_v26  ;;  %360 = vset.pattern.permute.xlu0 (!%p188_p2), %v374_v26  ;;  %v375_v34 = vmov (!%p188_p2), 839922192  }
   0x7   : > { %v251_v16 = vshrl.u32 (!%p188_p2), %v250_v13, 7  ;;  %v249_v22 = vld [vmem:[%s447_s3] sm:$0xf] (!%p188_p2)  ;;  %v271_v35 = vunpack.c.l.s4 (!%p188_p2), %v375_v34 }
   0x8   : > { %v258_v27 = vld [vmem:[%s448_s4] sm:$0xf] (!%p188_p2) }
   0x9   : > { %v252_v20 = vsub.s32 (!%p188_p2), 0, %v251_v16  ;;  %v272_v36 = vunpack.c.0.s8 (!%p188_p2), %v271_v35 }
   0xb   : > { %v275_v37 = vsub.s32 (!%p188_p2), %v272_v36, %v251_v16 }
   0xd   : > { %s451_s19 = smov (!%p215_p3, %s335_s19), 1 }
   0xe   : > { %s347_s20 = sshll.u32 %s451_s19, 3 }
   0xf   : > { %s219_s23 = scalar_lea.vmem %s444_s0, %s347_s20  ;;  %s224_s9 = scalar_lea.vmem %s449_s5, %s347_s20 }
  0x10   : > { %v225_v0 = vld [vmem:[%s219_s23] sm:$0xff] }
  0x11   : > { %v227_v1 = vcombine.high %v225_v0, %v225_v0  ;;  %v230_v2 = vsel %vm229_vm0, %v225_v0, 0.0 }
  0x13   : > { %v231_v3 = vsel %vm229_vm0, %v227_v1, 0.0 }
  0x14   : > { %v232_v4 = vadd.f32 %v231_v3, %v230_v2 }
  0x16   : > { %233 = vadd.xlane.f32.xlu0 %v232_v4 }
  0xa3   : > { %v234_v6 = vpop.xlane.xlu0 %233 }
  0xa4   : > { %v235_v7 = vmul.f32 0.00390625, %v234_v6 }
  0xa6   : > { %v237_v8 = vmul.f32 %v236_v5, %v235_v7 }
  0xa8   : > { %v239_v9 = vsel %vm238_vm1, %v237_v8, 0.0 }
  0xa9   : > { %v240_v10 = vrot.slane %v239_v9, 4 }
  0xab   : > { %v241_v11 = vadd.f32 %v240_v10, %v239_v9 }
  0xad   : > { %v242_v12 = vrot.slane %v241_v11, 2 }
  0xaf   : > { %v243_v14 = vadd.f32 %v242_v12, %v241_v11 }
  0xb1   : > { %v244_v15 = vrot.slane %v243_v14, 1 }
  0xb3   : > { %v245_v18 = vadd.f32 %v244_v15, %v243_v14 }
  0xb5   : > { %v247_v19 = vadd.f32 %v246_v17, %v245_v18 }
  0xb7   : > { %v248_v21 = vmax.f32 %v247_v19, 0.0 }
  0xb9   : > { %v253_v23 = vrot.slane %v248_v21, %v252_v20 }
  0xbb   : > { %v254_v24 = vmul.f32 %v253_v23, %v249_v22 }
  0xbd   : > { %v255_v25 = vsel %vm238_vm1, %v254_v24, 0.0 }
  0xbe   : > { %256 = vadd.xlane.f32.xlu0 %v255_v25 }
 0x14b   : > { %v257_v28 = vpop.xlane.xlu0 %256 }
 0x14c   : > { %v259_v29 = vadd.f32 %v258_v27, %v257_v28 }
 0x14e   : > { %v344_v30 = vmul.f32 -1.442695, %v259_v29 }
 0x150   : > { %362 = vpow2.f32 %v344_v30 }
 0x15a   : > { %v363_v31 = vpop.eup %362 }
 0x15b   : > { %v263_v32 = vadd.f32 1.0, %v363_v31 }
 0x15d   : > { %364 = vrcp.f32 %v263_v32 }
 0x167   : > { %v365_v33 = vpop.eup %364 }
 0x168   : > { %268 = vperm.xlu1 %359, %v365_v33  }
 0x1e7   : > { %v269_v38 = vpop.permute.xlu1 %268 }
 0x1e8   : > { %v276_v39 = vrot.slane %v269_v38, %v275_v37 }
 0x1ea   : > { %v278_v40 = vmul.f32 %v276_v39, %v225_v0 }
 0x1ec   : > { %279 = vst [vmem:[%s224_s9] sm:$0xff] %v278_v40 }
 0x1ed PF: > { %s15_s18 = sadd.s32 1, %s372_s18  }
 0x1ee   : > { %p12_p4 = scmp.ge.s32.totalorder %s15_s18, 4  }
 0x1f0   :  { %14 = sbr.rel (!%p12_p4) target bundleno = 1 (0x1), region = 70 }

</bundles_post_ra>
